<compile_context>
chip_gen: v7x
topology: tpu7x:2x2x1
jax: 0.10.0
libtpu: 0.0.40
codegen_flags: <defaults>
</compile_context>

<pallas_src>
import functools

import jax
import jax.numpy as jnp
from jax.experimental import pallas as pl
from jax.experimental.pallas import tpu as pltpu


def _distance_head_kernel(x_ref, y_ref, w1_ref, b1_ref, w2_ref, b2_ref, o_ref):
    # x_ref, y_ref: (C, tm)      w1_ref: (hidden, C)   b1_ref: (hidden, 1)
    # w2_ref: (1, hidden)        b2_ref: SMEM (1,)     o_ref: (1, tm)
    d = x_ref[...] - y_ref[...]                                        # (C, tm)
    h = jnp.dot(w1_ref[...], d, preferred_element_type=jnp.float32)    # (hidden, tm)
    h = h + b1_ref[...]                                                # bcast over lanes
    # LeakyReLU with PyTorch default negative_slope=0.01
    h = jnp.where(h > 0, h, 0.01 * h)
    z = jnp.dot(w2_ref[...], h, preferred_element_type=jnp.float32)    # (1, tm)
    z = z + b2_ref[0]
    o_ref[...] = jax.nn.sigmoid(z).astype(o_ref.dtype)


@functools.partial(jax.jit, static_argnames=("dims", "tm"))
def distance_head_forward(x, y, w1, b1, w2, b2, *, dims=3, tm=4096):
    """x, y: (N, C, D, H, W) or (C, D, H, W) float32. Returns PyTorch-equivalent output.

    w1: (hidden, C), b1: (hidden, 1), w2: (1, hidden), b2: (1,)  (conv weights squeezed).
    """
    batched = x.ndim == dims + 2
    if not batched:
        x = x[None]
        y = y[None]
    N, C = x.shape[0], x.shape[1]
    spatial = x.shape[2:]
    S = 1
    for s in spatial:
        S *= s
    hidden = w1.shape[0]

    # channels-first flatten: pure reshape, no HBM transpose pass
    xf = x.reshape(N, C, S)
    yf = y.reshape(N, C, S)

    # lane alignment: pad spatial axis to a multiple of 128 only if needed
    Sp = ((S + 127) // 128) * 128
    if Sp != S:
        xf = jnp.pad(xf, ((0, 0), (0, 0), (0, Sp - S)))
        yf = jnp.pad(yf, ((0, 0), (0, 0), (0, Sp - S)))

    # effective spatial tile: big (amortize per-step overhead), 128-aligned
    tm_eff = min(tm, Sp)
    if tm_eff < Sp:
        tm_eff = max(128, (tm_eff // 128) * 128)
    n_tiles = pl.cdiv(Sp, tm_eff)

    out = pl.pallas_call(
        _distance_head_kernel,
        out_shape=jax.ShapeDtypeStruct((N, 1, Sp), jnp.float32),
        grid_spec=pltpu.PrefetchScalarGridSpec(
            num_scalar_prefetch=0,
            grid=(N, n_tiles),
            in_specs=[
                pl.BlockSpec((None, C, tm_eff), lambda n, s: (n, 0, s)),   # x tile (C, tm)
                pl.BlockSpec((None, C, tm_eff), lambda n, s: (n, 0, s)),   # y tile (C, tm)
                pl.BlockSpec((hidden, C), lambda n, s: (0, 0)),            # W1 (resident)
                pl.BlockSpec((hidden, 1), lambda n, s: (0, 0)),            # b1 (resident)
                pl.BlockSpec((1, hidden), lambda n, s: (0, 0)),            # W2 (resident)
                pl.BlockSpec(memory_space=pltpu.MemorySpace.SMEM),         # b2 scalar
            ],
            out_specs=pl.BlockSpec((None, 1, tm_eff), lambda n, s: (n, 0, s)),
        ),
        compiler_params=pltpu.CompilerParams(
            dimension_semantics=("parallel", "parallel"),
        ),
    )(xf, yf, w1, b1, w2, b2)

    out = out[:, 0, :S].reshape((N,) + spatial)
    if not batched:
        # PyTorch: unbatched input -> conv out (1, D, H, W) -> unsqueeze(0) -> (1, 1, D, H, W)
        out = out.reshape((1, 1) + spatial)
    # batched: PyTorch conv out (N, 1, D, H, W) -> squeeze(1) -> (N, D, H, W)
    return out


def init_params(key, in_channels=12, incr_factor=12):
    """Deterministic synthetic init mirroring the PyTorch __init__ shapes (channels-first)."""
    hidden = in_channels * incr_factor
    k1, k2, k3, k4 = jax.random.split(key, 4)
    # kaiming_normal_ fan_out: conv1 weight (hidden, in_channels, 1,1,1), fan_out = hidden, relu gain
    std1 = jnp.sqrt(2.0) / jnp.sqrt(hidden)
    w1 = jax.random.normal(k1, (hidden, in_channels), jnp.float32) * std1        # (hidden, C)
    # conv2 weight (1, hidden, 1,1,1), fan_out = 1, sigmoid gain = 1
    w2 = jax.random.normal(k2, (1, hidden), jnp.float32) * 1.0                   # (1, hidden)
    # PyTorch default conv bias init: U(-1/sqrt(fan_in), 1/sqrt(fan_in))
    b1 = jax.random.uniform(
        k3, (hidden, 1), jnp.float32,
        -1.0 / jnp.sqrt(in_channels), 1.0 / jnp.sqrt(in_channels))
    b2 = jax.random.uniform(
        k4, (1,), jnp.float32,
        -1.0 / jnp.sqrt(hidden), 1.0 / jnp.sqrt(hidden))
    return w1, b1, w2, b2


def _reference(x, y, w1, b1, w2, b2, dims=3):
    """Pure-JAX reference (channels-first matmul form) for sanity checking."""
    batched = x.ndim == dims + 2
    if not batched:
        x, y = x[None], y[None]
    N, C = x.shape[0], x.shape[1]
    spatial = x.shape[2:]
    d = (x - y).reshape(N, C, -1)                                 # (N, C, S)
    h = jnp.einsum("oc,ncs->nos", w1, d) + b1[None]               # (N, hidden, S)
    h = jnp.where(h > 0, h, 0.01 * h)
    z = jnp.einsum("oc,ncs->nos", w2, h) + b2.reshape(1, 1, 1)    # (N, 1, S)
    out = jax.nn.sigmoid(z).reshape((N, 1) + spatial)
    if batched:
        out = out[:, 0]                                           # squeeze(1)
    return out


if __name__ == "__main__":
    in_channels, incr_factor, dims = 12, 12, 3
    N, D, H, W = 2, 8, 8, 8

    key = jax.random.PRNGKey(0)
    kx, ky, kp, kx2, ky2 = jax.random.split(key, 5)
    x = jax.random.normal(kx, (N, in_channels, D, H, W), jnp.float32)
    y = jax.random.normal(ky, (N, in_channels, D, H, W), jnp.float32)
    w1, b1, w2, b2 = init_params(kp, in_channels, incr_factor)

    out = distance_head_forward(x, y, w1, b1, w2, b2, dims=dims)
    jax.block_until_ready(out)
    ref = _reference(x, y, w1, b1, w2, b2, dims=dims)
    assert out.shape == (N, D, H, W), out.shape
    assert jnp.allclose(out, ref, atol=2e-5, rtol=1e-5)

    # unbatched (CDHW) path
    out_u = distance_head_forward(x[0], y[0], w1, b1, w2, b2, dims=dims)
    jax.block_until_ready(out_u)
    ref_u = _reference(x[0], y[0], w1, b1, w2, b2, dims=dims)
    assert out_u.shape == (1, 1, D, H, W), out_u.shape
    assert jnp.allclose(out_u, ref_u, atol=2e-5, rtol=1e-5)

    # non-128-aligned spatial size exercises the lane-pad / slice path
    x2 = jax.random.normal(kx2, (1, in_channels, 5, 6, 7), jnp.float32)
    y2 = jax.random.normal(ky2, (1, in_channels, 5, 6, 7), jnp.float32)
    out2 = distance_head_forward(x2, y2, w1, b1, w2, b2, dims=dims)
    jax.block_until_ready(out2)
    ref2 = _reference(x2, y2, w1, b1, w2, b2, dims=dims)
    assert out2.shape == (1, 5, 6, 7), out2.shape
    assert jnp.allclose(out2, ref2, atol=2e-5, rtol=1e-5)

    print("KERNEL_OK")
</pallas_src>

<mosaic_0001>
module attributes {stable_mosaic.version = 11 : i64} {
  func.func @_distance_head_kernel(%arg0: i32, %arg1: i32, %arg2: memref<1x12x512xf32, #tpu.memory_space<vmem>>, %arg3: memref<1x12x512xf32, #tpu.memory_space<vmem>>, %arg4: memref<144x12xf32, #tpu.memory_space<vmem>>, %arg5: memref<144x1xf32, #tpu.memory_space<vmem>>, %arg6: memref<1x144xf32, #tpu.memory_space<vmem>>, %arg7: memref<1xf32, #tpu.memory_space<smem>>, %arg8: memref<1x1x512xf32, #tpu.memory_space<vmem>>) attributes {dimension_semantics = [#tpu.dimension_semantics<parallel>, #tpu.dimension_semantics<parallel>], iteration_bounds = array<i64: 2, 1>, scalar_prefetch = 0 : i64, scratch_operands = 0 : i64, tpu.core_type = #tpu.core_type<tc>, window_params = [{transform_indices = @transform_0, window_bounds = array<i64: 1, 12, 512>}, {transform_indices = @transform_1, window_bounds = array<i64: 1, 12, 512>}, {pipeline_mode = #tpu.pipeline_mode<synchronous>, transform_indices = @transform_2, window_bounds = array<i64: 144, 12>}, {pipeline_mode = #tpu.pipeline_mode<synchronous>, transform_indices = @transform_3, window_bounds = array<i64: 144, 1>}, {pipeline_mode = #tpu.pipeline_mode<synchronous>, transform_indices = @transform_4, window_bounds = array<i64: 1, 144>}, {transform_indices = @transform_5, window_bounds = array<i64: 1>}, {transform_indices = @transform_6, window_bounds = array<i64: 1, 1, 512>}]} {
    %c0 = arith.constant 0 : index
    %c0_0 = arith.constant 0 : index
    %c0_1 = arith.constant 0 : index
    %0 = vector.load %arg2[%c0, %c0_0, %c0_1] : memref<1x12x512xf32, #tpu.memory_space<vmem>>, vector<1x12x512xf32>
    %1 = vector.shape_cast %0 : vector<1x12x512xf32> to vector<12x512xf32>
    %c0_2 = arith.constant 0 : index
    %c0_3 = arith.constant 0 : index
    %c0_4 = arith.constant 0 : index
    %2 = vector.load %arg3[%c0_2, %c0_3, %c0_4] : memref<1x12x512xf32, #tpu.memory_space<vmem>>, vector<1x12x512xf32>
    %3 = vector.shape_cast %2 : vector<1x12x512xf32> to vector<12x512xf32>
    %4 = arith.subf %1, %3 : vector<12x512xf32>
    %c0_5 = arith.constant 0 : index
    %c0_6 = arith.constant 0 : index
    %5 = vector.load %arg4[%c0_5, %c0_6] : memref<144x12xf32, #tpu.memory_space<vmem>>, vector<144x12xf32>
    %cst = arith.constant dense<0.000000e+00> : vector<144x512xf32>
    %6 = tpu.matmul %5, %4, %cst {dimension_numbers = #tpu.dot_dimension_numbers<[1], [0], [0], [1], [0, 0, 1, 1], [], []>} : vector<144x12xf32>, vector<12x512xf32>, vector<144x512xf32> -> vector<144x512xf32>
    %c0_7 = arith.constant 0 : index
    %c0_8 = arith.constant 0 : index
    %7 = vector.load %arg5[%c0_7, %c0_8] : memref<144x1xf32, #tpu.memory_space<vmem>>, vector<144x1xf32>
    %8 = vector.broadcast %7 : vector<144x1xf32> to vector<144x512xf32>
    %9 = arith.addf %6, %8 : vector<144x512xf32>
    %cst_9 = arith.constant 0.000000e+00 : f32
    %10 = vector.broadcast %cst_9 : f32 to vector<144x512xf32>
    %11 = arith.cmpf ogt, %9, %10 : vector<144x512xf32>
    %cst_10 = arith.constant 0.00999999977 : f32
    %12 = vector.broadcast %cst_10 : f32 to vector<144x512xf32>
    %13 = arith.mulf %12, %9 : vector<144x512xf32>
    %14 = arith.select %11, %9, %13 : vector<144x512xi1>, vector<144x512xf32>
    %c0_11 = arith.constant 0 : index
    %c0_12 = arith.constant 0 : index
    %15 = vector.load %arg6[%c0_11, %c0_12] : memref<1x144xf32, #tpu.memory_space<vmem>>, vector<1x144xf32>
    %cst_13 = arith.constant dense<0.000000e+00> : vector<1x512xf32>
    %16 = tpu.matmul %15, %14, %cst_13 {dimension_numbers = #tpu.dot_dimension_numbers<[1], [0], [0], [1], [0, 0, 1, 1], [], []>} : vector<1x144xf32>, vector<144x512xf32>, vector<1x512xf32> -> vector<1x512xf32>
    %c0_14 = arith.constant 0 : index
    %17 = memref.load %arg7[%c0_14] : memref<1xf32, #tpu.memory_space<smem>>
    %18 = vector.broadcast %17 : f32 to vector<1x512xf32>
    %19 = arith.addf %16, %18 : vector<1x512xf32>
    %20 = arith.negf %19 : vector<1x512xf32>
    %21 = math.exp %20 : vector<1x512xf32>
    %cst_15 = arith.constant 1.000000e+00 : f32
    %22 = vector.broadcast %cst_15 : f32 to vector<1x512xf32>
    %23 = arith.addf %22, %21 : vector<1x512xf32>
    %24 = arith.divf %22, %23 : vector<1x512xf32>
    %c0_16 = arith.constant 0 : index
    %c0_17 = arith.constant 0 : index
    %c0_18 = arith.constant 0 : index
    %25 = vector.load %arg8[%c0_16, %c0_17, %c0_18] : memref<1x1x512xf32, #tpu.memory_space<vmem>>, vector<1x1x512xf32>
    %26 = vector.shape_cast %25 : vector<1x1x512xf32> to vector<1x512xf32>
    %27 = vector.shape_cast %24 : vector<1x512xf32> to vector<1x1x512xf32>
    tpu.vector_store %arg8[%c0_16, %c0_17, %c0_18], %27 {strides = array<i32>} : memref<1x1x512xf32, #tpu.memory_space<vmem>>, vector<1x1x512xf32>,
    return
  }
  func.func @transform_0(%arg0: i32, %arg1: i32) -> (i32, i32, i32) {
    %c0_i32 = arith.constant 0 : i32
    %c0_i32_0 = arith.constant 0 : i32
    return %arg0, %c0_i32, %arg1 : i32, i32, i32
  }
  func.func @transform_1(%arg0: i32, %arg1: i32) -> (i32, i32, i32) {
    %c0_i32 = arith.constant 0 : i32
    %c0_i32_0 = arith.constant 0 : i32
    return %arg0, %c0_i32, %arg1 : i32, i32, i32
  }
  func.func @transform_2(%arg0: i32, %arg1: i32) -> (i32, i32) {
    %c0_i32 = arith.constant 0 : i32
    %c0_i32_0 = arith.constant 0 : i32
    %c0_i32_1 = arith.constant 0 : i32
    return %c0_i32, %c0_i32_0 : i32, i32
  }
  func.func @transform_3(%arg0: i32, %arg1: i32) -> (i32, i32) {
    %c0_i32 = arith.constant 0 : i32
    %c0_i32_0 = arith.constant 0 : i32
    %c0_i32_1 = arith.constant 0 : i32
    return %c0_i32, %c0_i32_0 : i32, i32
  }
  func.func @transform_4(%arg0: i32, %arg1: i32) -> (i32, i32) {
    %c0_i32 = arith.constant 0 : i32
    %c0_i32_0 = arith.constant 0 : i32
    %c0_i32_1 = arith.constant 0 : i32
    return %c0_i32, %c0_i32_0 : i32, i32
  }
  func.func @transform_5(%arg0: i32, %arg1: i32) -> i32 {
    %c0_i32 = arith.constant 0 : i32
    %c0_i32_0 = arith.constant 0 : i32
    return %c0_i32 : i32
  }
  func.func @transform_6(%arg0: i32, %arg1: i32) -> (i32, i32, i32) {
    %c0_i32 = arith.constant 0 : i32
    %c0_i32_0 = arith.constant 0 : i32
    return %arg0, %c0_i32, %arg1 : i32, i32, i32
  }
}

</mosaic_0001>

<bundles_post_ra>
// kernel: squeeze.1
= control target key start
LH: loop header
LB: loop body
LE: loop exit
PB: predicated region body
PF: predicated region fallthrough
CT: control target
= control target key end

     0   :  { %s460_s0 = inlined_call_operand.vmem [shape: f32[2,512], index: 0, kind: input, shape index: {}]   ;;  %s461_s1 = inlined_call_operand.hbm [shape: f32[2,8,8,8], index: 1, kind: output, shape index: {}]  }
   0x1   :  { %v299_v0 = vld [vmem:[%s460_s0 + $0x6] sm:$0x3]  ;;  %v300_v1 = vld [vmem:[%s460_s0 + $0x4] sm:$0x3]  ;;  %v301_v2 = vld [vmem:[%s460_s0 + $0x2] sm:$0x3] }
   0x2   :  { %9 = vst [vmem:[#allocation2 + $0x18] sm:$0x3] %v299_v0  ;;  %14 = vst [vmem:[#allocation2 + $0x10] sm:$0x3] %v300_v1  ;;  %v19_v3 = vld [vmem:[%s460_s0] sm:$0x3] }
   0x3   :  { %18 = vst [vmem:[#allocation2 + $0x8] sm:$0x3] %v301_v2  ;;  %20 = vst [vmem:[#allocation2] sm:$0x3] %v19_v3 }
   0x4   :  { %2 = vsyncpa [#allocation1], 0  ;;  %vm50_vm0 = vcmask 1047556   ;;  %s342_s0 = smov 120   ;;  %s343_s14 = smov 104   ;;  %vm22_vm1 = vcmask 64512  }
   0x5   :  { %s344_s15 = smov 112   ;;  %s345_s16 = smov 96  }
   0x6   :  { %s346_s17 = smov 88   ;;  %s347_s18 = smov 80  }
   0x7   :  { %s348_s19 = smov 72   ;;  %s349_s20 = smov 64  }
   0x8   :  { %s350_s21 = smov 56   ;;  %s351_s22 = smov 48  }
   0x9   :  { %v49_v4 = vld.sshfl [vmem:[#allocation2 + $0x10] sm:$0xff pattern:$0x91800000]   ;;  %s352_s23 = smov 40   ;;  %s353_s24 = smov 32  }
   0xa   :  { %v47_v5 = vld.sshfl [vmem:[#allocation2] sm:$0xff pattern:$0x99999180]   ;;  %v34_v9 = vld [vmem:[#allocation2 + $0x10] sm:$0x3]   ;;  %s354_s25 = smov 24  }
   0xb   :  { %v51_v6 = vsel %vm50_vm0, %v49_v4, %v47_v5  ;;  %v21_v7 = vld [vmem:[#allocation2] sm:$0x3]   ;;  %v27_v8 = vld [vmem:[#allocation2 + $0x8] sm:$0x3]   ;;  %37 = vst.msk [vmem:[#allocation0 + $0x20] sm:$0x1] %vm22_vm1, %v34_v9  }
   0xc   :  { %52 = vrot.lane.b32.xlu0 %v51_v6, %s342_s0  ;;  %84 = vrot.lane.b32.xlu1 %v51_v6, %s343_s14  ;;  %23 = vst.msk [vmem:[#allocation0] sm:$0x1] %vm22_vm1, %v21_v7   ;;  %25 = vst.msk [vmem:[#allocation0 + $0x3f] sm:$0x2] %vm22_vm1, %v21_v7   ;;  %v41_v10 = vld [vmem:[#allocation2 + $0x18] sm:$0x3]  }
   0xd   :  { %30 = vst.msk [vmem:[#allocation0 + $0x10] sm:$0x1] %vm22_vm1, %v27_v8   ;;  %32 = vst.msk [vmem:[#allocation0 + $0x4f] sm:$0x2] %vm22_vm1, %v27_v8   ;;  %s355_s26 = smov 16   ;;  %s356_s27 = smov 8  }
   0xe   :  { %39 = vst.msk [vmem:[#allocation0 + $0x5f] sm:$0x2] %vm22_vm1, %v34_v9   ;;  %44 = vst.msk [vmem:[#allocation0 + $0x30] sm:$0x1] %vm22_vm1, %v41_v10   ;;  %s357_s28 = smov [#allocation0]  }
   0xf   :  { %46 = vst.msk [vmem:[#allocation0 + $0x6f] sm:$0x2] %vm22_vm1, %v41_v10   ;;  %s291_s29 = sshll.u32 %s357_s28, 4  ;;  %s292_s29 = int_to_ptr.vmem [resolvable:$true] %s291_s29 }
  0x10   :  { %68 = vrot.lane.b32.xlu0 %v51_v6, %s344_s15  ;;  %100 = vrot.lane.b32.xlu1 %v51_v6, %s345_s16  ;;  %s318_s30 = scalar_lea.vmem %s292_s29, 2048  ;;  %p323_p1 = scmp.lt.s32.totalorder %s292_s29, %s292_s29 }
  0x11   :  { %p319_p0 = scmp.ne.s32.totalorder %s292_s29, %s318_s30  ;;  %p324_p2 = scmp.lt.s32.totalorder %s318_s30, %s318_s30 }
  0x13   :  { %p325_p3 = por %p324_p2, %p323_p1 }
  0x14   :  { %116 = vrot.lane.b32.xlu0 %v51_v6, %s346_s17  ;;  %132 = vrot.lane.b32.xlu1 %v51_v6, %s347_s18 }
  0x15   :  { %p326_p4 = pnand %p325_p3, %p319_p0 }
  0x18   :  { %148 = vrot.lane.b32.xlu0 %v51_v6, %s348_s19  ;;  %164 = vrot.lane.b32.xlu1 %v51_v6, %s349_s20 }
  0x1c   :  { %180 = vrot.lane.b32.xlu0 %v51_v6, %s350_s21  ;;  %196 = vrot.lane.b32.xlu1 %v51_v6, %s351_s22 }
  0x20   :  { %212 = vrot.lane.b32.xlu0 %v51_v6, %s352_s23  ;;  %228 = vrot.lane.b32.xlu1 %v51_v6, %s353_s24 }
  0x24   :  { %244 = vrot.lane.b32.xlu0 %v51_v6, %s354_s25  ;;  %260 = vrot.lane.b32.xlu1 %v51_v6, %s355_s26 }
  0x28   :  { %276 = vrot.lane.b32.xlu0 %v51_v6, %s356_s27 }
  0x7e   :  { %v53_v11 = vpop.permute.xlu0 %52   ;;  %v85_v12 = vpop.permute.xlu1 %84  }
  0x7f   :  { %56 = vst.msk [vmem:[#allocation0 + $0x1] ss:$16 sm:$0x3] %vm22_vm1, %v53_v11   ;;  %58 = vst.msk [vmem:[#allocation0 + $0x21] ss:$16 sm:$0xc] %vm22_vm1, %v53_v11  }
  0x80   :  { %60 = vst.msk [vmem:[#allocation0 - $0x1f] ss:$16 sm:$0x30] %vm22_vm1, %v53_v11   ;;  %62 = vst.msk [vmem:[#allocation0 + $0x1] ss:$16 sm:$0xc0] %vm22_vm1, %v53_v11  }
  0x81   :  { %88 = vst.msk [vmem:[#allocation0 + $0x3] ss:$16 sm:$0x3] %vm22_vm1, %v85_v12   ;;  %90 = vst.msk [vmem:[#allocation0 + $0x23] ss:$16 sm:$0xc] %vm22_vm1, %v85_v12  }
  0x82   :  { %92 = vst.msk [vmem:[#allocation0 - $0x1d] ss:$16 sm:$0x30] %vm22_vm1, %v85_v12   ;;  %94 = vst.msk [vmem:[#allocation0 + $0x3] ss:$16 sm:$0xc0] %vm22_vm1, %v85_v12   ;;  %v69_v13 = vpop.permute.xlu0 %68   ;;  %v101_v14 = vpop.permute.xlu1 %100  }
  0x83   :  { %72 = vst.msk [vmem:[#allocation0 + $0x2] ss:$16 sm:$0x3] %vm22_vm1, %v69_v13   ;;  %74 = vst.msk [vmem:[#allocation0 + $0x22] ss:$16 sm:$0xc] %vm22_vm1, %v69_v13  }
  0x84   :  { %76 = vst.msk [vmem:[#allocation0 - $0x1e] ss:$16 sm:$0x30] %vm22_vm1, %v69_v13   ;;  %78 = vst.msk [vmem:[#allocation0 + $0x2] ss:$16 sm:$0xc0] %vm22_vm1, %v69_v13  }
  0x85   :  { %104 = vst.msk [vmem:[#allocation0 + $0x4] ss:$16 sm:$0x3] %vm22_vm1, %v101_v14   ;;  %106 = vst.msk [vmem:[#allocation0 + $0x24] ss:$16 sm:$0xc] %vm22_vm1, %v101_v14  }
  0x86   :  { %108 = vst.msk [vmem:[#allocation0 - $0x1c] ss:$16 sm:$0x30] %vm22_vm1, %v101_v14   ;;  %110 = vst.msk [vmem:[#allocation0 + $0x4] ss:$16 sm:$0xc0] %vm22_vm1, %v101_v14   ;;  %v117_v15 = vpop.permute.xlu0 %116   ;;  %v133_v16 = vpop.permute.xlu1 %132  }
  0x87   :  { %120 = vst.msk [vmem:[#allocation0 + $0x5] ss:$16 sm:$0x3] %vm22_vm1, %v117_v15   ;;  %122 = vst.msk [vmem:[#allocation0 + $0x25] ss:$16 sm:$0xc] %vm22_vm1, %v117_v15  }
  0x88   :  { %124 = vst.msk [vmem:[#allocation0 - $0x1b] ss:$16 sm:$0x30] %vm22_vm1, %v117_v15   ;;  %126 = vst.msk [vmem:[#allocation0 + $0x5] ss:$16 sm:$0xc0] %vm22_vm1, %v117_v15  }
  0x89   :  { %136 = vst.msk [vmem:[#allocation0 + $0x6] ss:$16 sm:$0x3] %vm22_vm1, %v133_v16   ;;  %138 = vst.msk [vmem:[#allocation0 + $0x26] ss:$16 sm:$0xc] %vm22_vm1, %v133_v16  }
  0x8a   :  { %140 = vst.msk [vmem:[#allocation0 - $0x1a] ss:$16 sm:$0x30] %vm22_vm1, %v133_v16   ;;  %142 = vst.msk [vmem:[#allocation0 + $0x6] ss:$16 sm:$0xc0] %vm22_vm1, %v133_v16   ;;  %v149_v17 = vpop.permute.xlu0 %148   ;;  %v165_v18 = vpop.permute.xlu1 %164  }
  0x8b   :  { %152 = vst.msk [vmem:[#allocation0 + $0x7] ss:$16 sm:$0x3] %vm22_vm1, %v149_v17   ;;  %154 = vst.msk [vmem:[#allocation0 + $0x27] ss:$16 sm:$0xc] %vm22_vm1, %v149_v17  }
  0x8c   :  { %156 = vst.msk [vmem:[#allocation0 - $0x19] ss:$16 sm:$0x30] %vm22_vm1, %v149_v17   ;;  %158 = vst.msk [vmem:[#allocation0 + $0x7] ss:$16 sm:$0xc0] %vm22_vm1, %v149_v17  }
  0x8d   :  { %168 = vst.msk [vmem:[#allocation0 + $0x8] ss:$16 sm:$0x3] %vm22_vm1, %v165_v18   ;;  %170 = vst.msk [vmem:[#allocation0 + $0x28] ss:$16 sm:$0xc] %vm22_vm1, %v165_v18  }
  0x8e   :  { %172 = vst.msk [vmem:[#allocation0 - $0x18] ss:$16 sm:$0x30] %vm22_vm1, %v165_v18   ;;  %174 = vst.msk [vmem:[#allocation0 + $0x8] ss:$16 sm:$0xc0] %vm22_vm1, %v165_v18   ;;  %v181_v19 = vpop.permute.xlu0 %180   ;;  %v197_v20 = vpop.permute.xlu1 %196  }
  0x8f   :  { %184 = vst.msk [vmem:[#allocation0 + $0x9] ss:$16 sm:$0x3] %vm22_vm1, %v181_v19   ;;  %186 = vst.msk [vmem:[#allocation0 + $0x29] ss:$16 sm:$0xc] %vm22_vm1, %v181_v19  }
  0x90   :  { %188 = vst.msk [vmem:[#allocation0 - $0x17] ss:$16 sm:$0x30] %vm22_vm1, %v181_v19   ;;  %190 = vst.msk [vmem:[#allocation0 + $0x9] ss:$16 sm:$0xc0] %vm22_vm1, %v181_v19  }
  0x91   :  { %200 = vst.msk [vmem:[#allocation0 + $0xa] ss:$16 sm:$0x3] %vm22_vm1, %v197_v20   ;;  %202 = vst.msk [vmem:[#allocation0 + $0x2a] ss:$16 sm:$0xc] %vm22_vm1, %v197_v20  }
  0x92   :  { %204 = vst.msk [vmem:[#allocation0 - $0x16] ss:$16 sm:$0x30] %vm22_vm1, %v197_v20   ;;  %206 = vst.msk [vmem:[#allocation0 + $0xa] ss:$16 sm:$0xc0] %vm22_vm1, %v197_v20   ;;  %v213_v21 = vpop.permute.xlu0 %212   ;;  %v229_v22 = vpop.permute.xlu1 %228  }
  0x93   :  { %216 = vst.msk [vmem:[#allocation0 + $0xb] ss:$16 sm:$0x3] %vm22_vm1, %v213_v21   ;;  %218 = vst.msk [vmem:[#allocation0 + $0x2b] ss:$16 sm:$0xc] %vm22_vm1, %v213_v21  }
  0x94   :  { %220 = vst.msk [vmem:[#allocation0 - $0x15] ss:$16 sm:$0x30] %vm22_vm1, %v213_v21   ;;  %222 = vst.msk [vmem:[#allocation0 + $0xb] ss:$16 sm:$0xc0] %vm22_vm1, %v213_v21  }
  0x95   :  { %232 = vst.msk [vmem:[#allocation0 + $0xc] ss:$16 sm:$0x3] %vm22_vm1, %v229_v22   ;;  %234 = vst.msk [vmem:[#allocation0 + $0x2c] ss:$16 sm:$0xc] %vm22_vm1, %v229_v22  }
  0x96   :  { %236 = vst.msk [vmem:[#allocation0 - $0x14] ss:$16 sm:$0x30] %vm22_vm1, %v229_v22   ;;  %238 = vst.msk [vmem:[#allocation0 + $0xc] ss:$16 sm:$0xc0] %vm22_vm1, %v229_v22   ;;  %v245_v23 = vpop.permute.xlu0 %244   ;;  %v261_v24 = vpop.permute.xlu1 %260  }
  0x97   :  { %248 = vst.msk [vmem:[#allocation0 + $0xd] ss:$16 sm:$0x3] %vm22_vm1, %v245_v23   ;;  %250 = vst.msk [vmem:[#allocation0 + $0x2d] ss:$16 sm:$0xc] %vm22_vm1, %v245_v23  }
  0x98   :  { %252 = vst.msk [vmem:[#allocation0 - $0x13] ss:$16 sm:$0x30] %vm22_vm1, %v245_v23   ;;  %254 = vst.msk [vmem:[#allocation0 + $0xd] ss:$16 sm:$0xc0] %vm22_vm1, %v245_v23  }
  0x99   :  { %264 = vst.msk [vmem:[#allocation0 + $0xe] ss:$16 sm:$0x3] %vm22_vm1, %v261_v24   ;;  %266 = vst.msk [vmem:[#allocation0 + $0x2e] ss:$16 sm:$0xc] %vm22_vm1, %v261_v24  }
  0x9a   :  { %268 = vst.msk [vmem:[#allocation0 - $0x12] ss:$16 sm:$0x30] %vm22_vm1, %v261_v24   ;;  %270 = vst.msk [vmem:[#allocation0 + $0xe] ss:$16 sm:$0xc0] %vm22_vm1, %v261_v24   ;;  %v277_v25 = vpop.permute.xlu0 %276  }
  0x9b   :  { %280 = vst.msk [vmem:[#allocation0 + $0xf] ss:$16 sm:$0x3] %vm22_vm1, %v277_v25   ;;  %282 = vst.msk [vmem:[#allocation0 + $0x2f] ss:$16 sm:$0xc] %vm22_vm1, %v277_v25  }
  0x9c   :  { %284 = vst.msk [vmem:[#allocation0 - $0x11] ss:$16 sm:$0x30] %vm22_vm1, %v277_v25   ;;  %286 = vst.msk [vmem:[#allocation0 + $0xf] ss:$16 sm:$0xc0] %vm22_vm1, %v277_v25  }
  0x9d   :  { %329 = shalt.err (!%p326_p4)
}
  0x9e   :  { %s330_s4 = scalar_lea.hbm %s461_s1, 2048 }
  0x9f   :  { %p331_p5 = scmp.ne.s32.totalorder %s461_s1, %s330_s4  ;;  %p334_p6 = scmp.lt.u32.totalorder %s330_s4, %s461_s1 }
  0xa1   :  { %p336_p7 = pnand %p334_p6, %p331_p5 }
  0xa3   :  { %339 = shalt.err (!%p336_p7)
}
  0xa4   :  { %294 = dma.vmem_to_hbm [thread:$0]  %s292_s29, 2048, %s461_s1, [#allocation1]  }
  0xa5   :  { %340 = dma.done.wait [#allocation1], 2048  }
  0xa6   :  { %341 = vsyncadd [#allocation1], 4294965248 }
  0xa7   :  { %296 = vsyncpa [#allocation1], 1 }

// kernel: distance_head_forward.1
= control target key start
LH: loop header
LB: loop body
LE: loop exit
PB: predicated region body
PF: predicated region fallthrough
CT: control target
= control target key end

     0   :  { %s1677_s23 = smov 0   ;;  %s1679_s24 = smov 0   ;;  %s2215_s0 = inlined_call_operand.vmem [shape: f32[2,12,512], index: 0, kind: input, shape index: {}]   ;;  %s2216_s1 = inlined_call_operand.vmem [shape: f32[2,12,512], index: 1, kind: input, shape index: {}]   ;;  %s2217_s2 = inlined_call_operand.vmem [shape: f32[144,12], index: 2, kind: input, shape index: {}]   ;;  %s2218_s3 = inlined_call_operand.vmem [shape: f32[144,1], index: 3, kind: input, shape index: {}]   ;;  %s2219_s4 = inlined_call_operand.vmem [shape: f32[1,144], index: 4, kind: input, shape index: {}]   ;;  %s2220_s5 = inlined_call_operand.<no memory space> [shape: f32[1], index: 5, kind: input, shape index: {}]   ;;  %s2221_s6 = inlined_call_operand.vmem [shape: f32[2,1,512], index: 6, kind: output, shape index: {}]  }
   0x1   :  { %11 = sst [smem:[#allocation2]] %s2220_s5  ;;  %s1681_s25 = smov 0  }
   0x2 LB: > { %s29_s5 = sadd.s32 1, %s1629_s24  ;;  %p1425_p0 = scmp.ge.s32.totalorder %s1633_s25, 1  ;;  %s1633_s25 = sphi %s1681_s25, %s17_s25   ;;  %s1629_s24 = sphi %s1679_s24, %s2225_s24   ;;  %s1625_s23 = sphi %s1677_s23, %s2224_s23  }
   0x3   : > { %p31_p1 = scmp.ge.s32.totalorder %s29_s5, 2  ;;  %p251_p2 = scmp.lt.s32.totalorder %s1633_s25, 3 }
   0x5   : > { %s2227_s5 = smov (%p31_p1, %s29_s5), 0  ;;  %p252_p3 = pnand %p1425_p0, %p251_p2 }
   0x6   : > { %p298_p4 = scmp.lt.s32.totalorder (!%p252_p3), %s1625_s23, 1  ;;  %v1635_v0 = vmov (!%p252_p3), 0.0   ;;  %vm531_vm0 = vcmask (!%p252_p3), 1043456   ;;  %v1636_v1 = vmov (!%p252_p3), 0   ;;  %vm1637_vm1 = vmmov (!%p252_p3), 1   ;;  %v368_v3 = vld [vmem:[%s2218_s3] sm:$0xff] (!%p252_p3) }
   0x7   : > { %255 = sbr.rel (%p252_p3) target bundleno = 584 (0x248), region = 44  ;;  %608 = vmatprep.mubr.f32.mxu0 (!%p252_p3), %v1635_v0  ;;  %781 = vmatprep.mubr.f32.mxu1 (!%p252_p3), %v1635_v0  ;;  %vm1706_vm2 = vmpackc.low (!%p252_p3), %vm531_vm0, %vm1637_vm1  ;;  %v369_v29 = vld [vmem:[%s2218_s3 + $0x8] sm:$0xff] (!%p252_p3)  ;;  %v370_v32 = vld [vmem:[%s2218_s3 + $0x10] sm:$0xff] (!%p252_p3)  ;;  %vm476_vm3 = vcmask (!%p252_p3), 97280   ;;  %vm1119_vm4 = vcmask (!%p252_p3), 130048   ;;  %s1107_s20 = sld [smem:[#allocation2]] (!%p252_p3) }
   0x8   : > { %1593 = vset.pattern.permute.xlu0 (!%p252_p3), %v1636_v1  ;;  %1594 = vset.pattern.permute.xlu1 (!%p252_p3), %v1636_v1  ;;  %v372_v33 = vld [vmem:[%s2218_s3 + $0x20] sm:$0xff] (!%p252_p3)  ;;  %v371_v36 = vld [vmem:[%s2218_s3 + $0x18] sm:$0xff] (!%p252_p3)  ;;  %v374_v37 = vld [vmem:[%s2218_s3 + $0x30] sm:$0xff] (!%p252_p3) }
   0x9   : > { %388 = vperm.xlu0 (!%p252_p3), %1593, %v368_v3   ;;  %398 = vperm.xlu1 (!%p252_p3), %1594, %v370_v32   ;;  %v350_v35 = vld [vmem:[%s2217_s2] sm:$0xff] (!%p252_p3)  ;;  %v351_v38 = vld [vmem:[%s2217_s2 + $0x8] sm:$0xff] (!%p252_p3)  ;;  %v352_v41 = vld [vmem:[%s2217_s2 + $0x10] sm:$0xff] (!%p252_p3) }
   0xa   : > { %v373_v39 = vld [vmem:[%s2218_s3 + $0x28] sm:$0xff] (!%p252_p3)  ;;  %v376_v40 = vld [vmem:[%s2218_s3 + $0x40] sm:$0xff] (!%p252_p3)  ;;  %v375_v42 = vld [vmem:[%s2218_s3 + $0x38] sm:$0xff] (!%p252_p3) }
   0xb   : > { %v378_v43 = vld [vmem:[%s2218_s3 + $0x50] sm:$0xff] (!%p252_p3)  ;;  %v353_v44 = vld [vmem:[%s2217_s2 + $0x18] sm:$0xff] (!%p252_p3)  ;;  %v377_v45 = vld [vmem:[%s2218_s3 + $0x48] sm:$0xff] (!%p252_p3) }
   0xc   : > { %v380_v46 = vld [vmem:[%s2218_s3 + $0x60] sm:$0xff] (!%p252_p3)  ;;  %v379_v48 = vld [vmem:[%s2218_s3 + $0x58] sm:$0xff] (!%p252_p3)  ;;  %v382_v49 = vld [vmem:[%s2218_s3 + $0x70] sm:$0xff] (!%p252_p3) }
   0xd   : > { %393 = vperm.xlu0 (!%p252_p3), %1593, %v369_v29   ;;  %403 = vperm.xlu1 (!%p252_p3), %1594, %v371_v36   ;;  %v354_v47 = vld [vmem:[%s2217_s2 + $0x20] sm:$0xff] (!%p252_p3)  ;;  %v355_v50 = vld [vmem:[%s2217_s2 + $0x28] sm:$0xff] (!%p252_p3)  ;;  %v356_v53 = vld [vmem:[%s2217_s2 + $0x30] sm:$0xff] (!%p252_p3) }
   0xe   : > { %s2229_s23 = smov (!%p298_p4, %s1625_s23), 1  ;;  %v381_v51 = vld [vmem:[%s2218_s3 + $0x68] sm:$0xff]  ;;  %v384_v52 = vld [vmem:[%s2218_s3 + $0x80] sm:$0xff]  ;;  %v383_v54 = vld [vmem:[%s2218_s3 + $0x78] sm:$0xff] }
   0xf   : > { %s1479_s26 = sshll.u32 %s2229_s23, 6  ;;  %v357_v55 = vld [vmem:[%s2217_s2 + $0x38] sm:$0xff]  ;;  %v385_v56 = vld [vmem:[%s2218_s3 + $0x88] sm:$0xff]  ;;  %v358_v57 = vld [vmem:[%s2217_s2 + $0x40] sm:$0xff]  ;;  %s1430_s21 = sshll.u32 %s2229_s23, 2 }
  0x10   : > { %s305_s29 = scalar_lea.vmem %s2215_s0, %s1479_s26  ;;  %s315_s8 = scalar_lea.vmem %s2216_s1, %s1479_s26  ;;  %v359_v58 = vld [vmem:[%s2217_s2 + $0x48] sm:$0xff]  ;;  %v360_v59 = vld [vmem:[%s2217_s2 + $0x50] sm:$0xff]  ;;  %v361_v60 = vld [vmem:[%s2217_s2 + $0x58] sm:$0xff] }
  0x11   : > { %v327_v4 = vld [vmem:[%s305_s29 + $0x8] sm:$0xff]  ;;  %v329_v9 = vld [vmem:[%s305_s29 + $0x18] sm:$0xff]  ;;  %v326_v14 = vld [vmem:[%s305_s29] sm:$0xff]  ;;  %408 = vperm.xlu0 %1593, %v372_v33   ;;  %413 = vperm.xlu1 %1594, %v373_v39   ;;  %s324_s27 = scalar_lea.vmem %s2221_s6, %s1430_s21 }
  0x12   : > { %v331_v5 = vld [vmem:[%s305_s29 + $0x28] sm:$0xf]  ;;  %v333_v10 = vld [vmem:[%s305_s29 + $0x38] sm:$0xf]  ;;  %v330_v17 = vld [vmem:[%s305_s29 + $0x20] sm:$0xf] }
  0x13   : > { %v335_v6 = vld [vmem:[%s315_s8 + $0x8] sm:$0xff]  ;;  %v337_v12 = vld [vmem:[%s315_s8 + $0x18] sm:$0xff]  ;;  %v334_v18 = vld [vmem:[%s315_s8] sm:$0xff] }
  0x14   : > { %v339_v7 = vld [vmem:[%s315_s8 + $0x28] sm:$0xf]  ;;  %v343_v8 = vsub.f32 %v327_v4, %v335_v6  ;;  %v341_v13 = vld [vmem:[%s315_s8 + $0x38] sm:$0xf]  ;;  %v345_v15 = vsub.f32 %v329_v9, %v337_v12  ;;  %v338_v19 = vld [vmem:[%s315_s8 + $0x20] sm:$0xf]  ;;  %v342_v21 = vsub.f32 %v326_v14, %v334_v18  ;;  %v1110_v4 = vlaneseq }
  0x15   : > { %v347_v11 = vsub.f32 %v331_v5, %v339_v7  ;;  %v349_v16 = vsub.f32 %v333_v10, %v341_v13  ;;  %v346_v22 = vsub.f32 %v330_v17, %v338_v19  ;;  %v328_v23 = vld [vmem:[%s305_s29 + $0x10] sm:$0xff]  ;;  %418 = vperm.xlu0 %1593, %v374_v37   ;;  %423 = vperm.xlu1 %1594, %v375_v42   ;;  %v362_v61 = vld [vmem:[%s2217_s2 + $0x60] sm:$0xff]  ;;  %v363_v62 = vld [vmem:[%s2217_s2 + $0x68] sm:$0xff] }
  0x16   : > { %v332_v24 = vld [vmem:[%s305_s29 + $0x30] sm:$0xf]  ;;  %v365_v1 = vld [vmem:[%s2217_s2 + $0x78] sm:$0xff]  ;;  %v366_v2 = vld [vmem:[%s2217_s2 + $0x80] sm:$0xff]  ;;  %v1897_v5 = vshrl.u32 %v1110_v4, 7 }
  0x17   : > { %v1481_v20 = vpack.c.bf16 %v347_v11, %v343_v8  ;;  %v336_v25 = vld [vmem:[%s315_s8 + $0x10] sm:$0xff]  ;;  %v1487_v26 = vpack.c.bf16 %v349_v16, %v345_v15  ;;  %v1484_v30 = vpack.c.bf16 %v346_v22, %v342_v21  ;;  %v367_v3 = vld [vmem:[%s2217_s2 + $0x88] sm:$0xff]  ;;  %v1106_v6 = vld [vmem:[%s2219_s4] sm:$0x3] }
  0x18   : > { %v340_v27 = vld [vmem:[%s315_s8 + $0x30] sm:$0xf]  ;;  %v344_v28 = vsub.f32 %v328_v23, %v336_v25  ;;  %v1112_v7 = vsub.s32 0, %v1897_v5  ;;  %v1116_v8 = vsub.s32 1, %v1897_v5 }
  0x19   : > { %1483 = vmatprep.subr.msk.bf16.mxu0 %vm1706_vm2, %v1481_v20  ;;  %v348_v31 = vsub.f32 %v332_v24, %v340_v27  ;;  %1489 = vmatprep.subr.msk.bf16.mxu1 %vm1706_vm2, %v1487_v26  ;;  %v364_v63 = vld [vmem:[%s2217_s2 + $0x70] sm:$0xff] }
  0x1a   : > { %1486 = vmatpush1.bf16.msk.msra.mxu0 %vm1706_vm2, %v1484_v30  ;;  %428 = vperm.xlu0 %1593, %v376_v40   ;;  %v1904_v9 = vrot.slane %v1106_v6, %v1112_v7 }
  0x1b   : > { %v1490_v34 = vpack.c.bf16 %v348_v31, %v344_v28  ;;  %433 = vperm.xlu1 %1594, %v377_v45  }
  0x1d   : > { %1492 = vmatpush1.bf16.msk.msra.mxu1 %vm1706_vm2, %v1490_v34  ;;  %1433 = vmatmul.mubr.msk.f32.vlgmr.msra.gmra.mrb[0].mxu0 %vm476_vm3, %v350_v35 }
  0x1e   : > { %614 = vmatprep.mubr.f32.mxu0 %v1635_v0  ;;  %438 = vperm.xlu0 %1593, %v378_v43  }
  0x1f   : > { %443 = vperm.xlu1 %1594, %v379_v48  }
  0x20   : > { %1453 = vmatmul.mubr.msk.f32.vlgmr.msra.gmra.mrb[0].mxu1 %vm476_vm3, %v350_v35 }
  0x21   : > { %787 = vmatprep.mubr.f32.mxu1 %v1635_v0  ;;  %1434 = vmatmul.mubr.msk.f32.gmra.mrb[2].mxu0 %vm476_vm3, %v351_v38 }
  0x22   : > { %620 = vmatprep.mubr.f32.mxu0 %v1635_v0  ;;  %448 = vperm.xlu0 %1593, %v380_v46  }
  0x23   : > { %453 = vperm.xlu1 %1594, %v381_v51  }
  0x24   : > { %1454 = vmatmul.mubr.msk.f32.gmra.mrb[2].mxu1 %vm476_vm3, %v351_v38 }
  0x25   : > { %793 = vmatprep.mubr.f32.mxu1 %v1635_v0  ;;  %1435 = vmatmul.mubr.msk.f32.gmra.mrb[4].mxu0 %vm476_vm3, %v352_v41 }
  0x26   : > { %626 = vmatprep.mubr.f32.mxu0 %v1635_v0  ;;  %458 = vperm.xlu0 %1593, %v382_v49  }
  0x27   : > { %463 = vperm.xlu1 %1594, %v383_v54  }
  0x28   : > { %1455 = vmatmul.mubr.msk.f32.gmra.mrb[4].mxu1 %vm476_vm3, %v352_v41 }
  0x29   : > { %799 = vmatprep.mubr.f32.mxu1 %v1635_v0  ;;  %1436 = vmatmul.mubr.msk.f32.gmra.mrb[6].mxu0 %vm476_vm3, %v353_v44 }
  0x2a   : > { %632 = vmatprep.mubr.f32.mxu0 %v1635_v0  ;;  %468 = vperm.xlu0 %1593, %v384_v52  }
  0x2b   : > { %473 = vperm.xlu1 %1594, %v385_v56  }
  0x2c   : > { %1456 = vmatmul.mubr.msk.f32.gmra.mrb[6].mxu1 %vm476_vm3, %v353_v44 }
  0x2d   : > { %805 = vmatprep.mubr.f32.mxu1 %v1635_v0  ;;  %1437 = vmatmul.mubr.msk.f32.gmra.mrb[8].mxu0 %vm476_vm3, %v354_v47 }
  0x2e   : > { %638 = vmatprep.mubr.f32.mxu0 %v1635_v0 }
  0x30   : > { %1457 = vmatmul.mubr.msk.f32.gmra.mrb[8].mxu1 %vm476_vm3, %v354_v47 }
  0x31   : > { %811 = vmatprep.mubr.f32.mxu1 %v1635_v0  ;;  %1438 = vmatmul.mubr.msk.f32.gmra.mrb[10].mxu0 %vm476_vm3, %v355_v50 }
  0x32   : > { %644 = vmatprep.mubr.f32.mxu0 %v1635_v0 }
  0x34   : > { %1458 = vmatmul.mubr.msk.f32.gmra.mrb[10].mxu1 %vm476_vm3, %v355_v50 }
  0x35   : > { %817 = vmatprep.mubr.f32.mxu1 %v1635_v0  ;;  %1439 = vmatmul.mubr.msk.f32.gmra.mrb[12].mxu0 %vm476_vm3, %v356_v53 }
  0x36   : > { %650 = vmatprep.mubr.f32.mxu0 %v1635_v0 }
  0x38   : > { %1459 = vmatmul.mubr.msk.f32.gmra.mrb[12].mxu1 %vm476_vm3, %v356_v53 }
  0x39   : > { %823 = vmatprep.mubr.f32.mxu1 %v1635_v0  ;;  %1440 = vmatmul.mubr.msk.f32.gmra.mrb[14].mxu0 %vm476_vm3, %v357_v55 }
  0x3a   : > { %656 = vmatprep.mubr.f32.mxu0 %v1635_v0 }
  0x3c   : > { %1460 = vmatmul.mubr.msk.f32.gmra.mrb[14].mxu1 %vm476_vm3, %v357_v55 }
  0x3d   : > { %829 = vmatprep.mubr.f32.mxu1 %v1635_v0  ;;  %1441 = vmatmul.mubr.msk.f32.gmra.mrb[16].mxu0 %vm476_vm3, %v358_v57 }
  0x3e   : > { %662 = vmatprep.mubr.f32.mxu0 %v1635_v0 }
  0x40   : > { %1461 = vmatmul.mubr.msk.f32.gmra.mrb[16].mxu1 %vm476_vm3, %v358_v57 }
  0x41   : > { %835 = vmatprep.mubr.f32.mxu1 %v1635_v0  ;;  %1442 = vmatmul.mubr.msk.f32.gmra.mrb[18].mxu0 %vm476_vm3, %v359_v58 }
  0x42   : > { %668 = vmatprep.mubr.f32.mxu0 %v1635_v0 }
  0x44   : > { %1462 = vmatmul.mubr.msk.f32.gmra.mrb[18].mxu1 %vm476_vm3, %v359_v58 }
  0x45   : > { %841 = vmatprep.mubr.f32.mxu1 %v1635_v0  ;;  %1443 = vmatmul.mubr.msk.f32.gmra.mrb[20].mxu0 %vm476_vm3, %v360_v59 }
  0x46   : > { %674 = vmatprep.mubr.f32.mxu0 %v1635_v0 }
  0x48   : > { %1463 = vmatmul.mubr.msk.f32.gmra.mrb[20].mxu1 %vm476_vm3, %v360_v59 }
  0x49   : > { %847 = vmatprep.mubr.f32.mxu1 %v1635_v0  ;;  %1444 = vmatmul.mubr.msk.f32.gmra.mrb[22].mxu0 %vm476_vm3, %v361_v60 }
  0x4a   : > { %680 = vmatprep.mubr.f32.mxu0 %v1635_v0 }
  0x4c   : > { %1464 = vmatmul.mubr.msk.f32.gmra.mrb[22].mxu1 %vm476_vm3, %v361_v60 }
  0x4d   : > { %853 = vmatprep.mubr.f32.mxu1 %v1635_v0  ;;  %1445 = vmatmul.mubr.msk.f32.gmra.mrb[24].mxu0 %vm476_vm3, %v362_v61 }
  0x4e   : > { %686 = vmatprep.mubr.f32.mxu0 %v1635_v0 }
  0x50   : > { %1465 = vmatmul.mubr.msk.f32.gmra.mrb[24].mxu1 %vm476_vm3, %v362_v61 }
  0x51   : > { %859 = vmatprep.mubr.f32.mxu1 %v1635_v0  ;;  %1446 = vmatmul.mubr.msk.f32.gmra.mrb[26].mxu0 %vm476_vm3, %v363_v62 }
  0x52   : > { %692 = vmatprep.mubr.f32.mxu0 %v1635_v0 }
  0x54   : > { %1466 = vmatmul.mubr.msk.f32.gmra.mrb[26].mxu1 %vm476_vm3, %v363_v62 }
  0x55   : > { %865 = vmatprep.mubr.f32.mxu1 %v1635_v0  ;;  %1447 = vmatmul.mubr.msk.f32.gmra.mrb[28].mxu0 %vm476_vm3, %v364_v63 }
  0x56   : > { %698 = vmatprep.mubr.f32.mxu0 %v1635_v0 }
  0x58   : > { %1467 = vmatmul.mubr.msk.f32.gmra.mrb[28].mxu1 %vm476_vm3, %v364_v63 }
  0x59   : > { %871 = vmatprep.mubr.f32.mxu1 %v1635_v0  ;;  %1448 = vmatmul.mubr.msk.f32.gmra.mrb[30].mxu0 %vm476_vm3, %v365_v1 }
  0x5a   : > { %704 = vmatprep.mubr.f32.mxu0 %v1635_v0 }
  0x5c   : > { %1468 = vmatmul.mubr.msk.f32.gmra.mrb[30].mxu1 %vm476_vm3, %v365_v1 }
  0x5d   : > { %877 = vmatprep.mubr.f32.mxu1 %v1635_v0  ;;  %1449 = vmatmul.mubr.msk.f32.gmra.mrb[32].mxu0 %vm476_vm3, %v366_v2 }
  0x5e   : > { %710 = vmatprep.mubr.f32.mxu0 %v1635_v0 }
  0x60   : > { %1469 = vmatmul.mubr.msk.f32.gmra.mrb[32].mxu1 %vm476_vm3, %v366_v2 }
  0x61   : > { %883 = vmatprep.mubr.f32.mxu1 %v1635_v0  ;;  %1450 = vmatmul.mubr.msk.f32.gmra.mrb[34].mxu0 %vm476_vm3, %v367_v3  ;;  %v1117_v0 = vrot.slane %v1106_v6, %v1116_v8 }
  0x63   : > { %1471 = vmatprep.mubr.msk.f32.mxu0 %vm1119_vm4, %v1117_v0 }
  0x64   : > { %1470 = vmatmul.mubr.msk.f32.gmra.mrb[34].mxu1 %vm476_vm3, %v367_v3 }
  0x65   : > { %1472 = vmatprep.mubr.msk.f32.mxu1 %vm1119_vm4, %v1117_v0 }
  0x88   : > { %v389_v10 = vpop.permute.xlu0 %388  ;;  %v399_v25 = vpop.permute.xlu1 %398 }
  0x8c   : > { %v394_v14 = vpop.permute.xlu0 %393  ;;  %v404_v49 = vpop.permute.xlu1 %403 }
  0xf0   : > { %v610_v11 = vpop.f32.mrb[0].mxu0 }
  0xf1   : > { %v611_v12 = vadd.f32 %v610_v11, %v389_v10  ;;  %v612_v13 = vpop.f32.mrb[1].mxu0 }
  0xf2   : > { %v613_v16 = vadd.f32 %v612_v13, %v389_v10  ;;  %v409_v13 = vpop.permute.xlu0 %408 }
  0xf3   : > { %v783_v15 = vpop.f32.mrb[0].mxu1  ;;  %v962_v17 = vmul.f32 0.01, %v611_v12  ;;  %vm890_vm5 = vcmp.gt.f32.partialorder %v611_v12, 0.0 }
  0xf4   : > { %v784_v18 = vadd.f32 %v783_v15, %v389_v10  ;;  %v785_v19 = vpop.f32.mrb[1].mxu1  ;;  %v616_v21 = vpop.f32.mrb[2].mxu0  ;;  %vm891_vm7 = vcmp.gt.f32.partialorder %v613_v16, 0.0  ;;  %v963_v26 = vmul.f32 0.01, %v613_v16 }
  0xf5   : > { %v786_v20 = vadd.f32 %v785_v19, %v389_v10  ;;  %v617_v23 = vadd.f32 %v616_v21, %v394_v14  ;;  %v618_v24 = vpop.f32.mrb[3].mxu0  ;;  %v1906_v29 = vsel %vm890_vm5, %v611_v12, %v962_v17 }
  0xf6   : > { %vm892_vm6 = vcmp.gt.f32.partialorder %v784_v18, 0.0  ;;  %v964_v22 = vmul.f32 0.01, %v784_v18  ;;  %v619_v28 = vadd.f32 %v618_v24, %v394_v14  ;;  %v1035_v52 = vsel %vm891_vm7, %v613_v16, %v963_v26 }
  0xf7   : > { %v789_v27 = vpop.f32.mrb[2].mxu1  ;;  %vm894_vm8 = vcmp.gt.f32.partialorder %v617_v23, 0.0  ;;  %v966_v30 = vmul.f32 0.01, %v617_v23  ;;  %vm893_vm9 = vcmp.gt.f32.partialorder %v786_v20, 0.0 }
  0xf8   : > { %v790_v31 = vadd.f32 %v789_v27, %v394_v14  ;;  %v791_v32 = vpop.f32.mrb[3].mxu1  ;;  %v1908_v33 = vsel %vm892_vm6, %v784_v18, %v964_v22  ;;  %v965_v34 = vmul.f32 0.01, %v786_v20  ;;  %v622_v36 = vpop.f32.mrb[4].mxu0  ;;  %vm895_vm11 = vcmp.gt.f32.partialorder %v619_v28, 0.0 }
  0xf9   : > { %v792_v35 = vadd.f32 %v791_v32, %v394_v14  ;;  %v1038_v37 = vsel %vm894_vm8, %v617_v23, %v966_v30  ;;  %v623_v39 = vadd.f32 %v622_v36, %v399_v25  ;;  %v624_v40 = vpop.f32.mrb[5].mxu0  ;;  %v967_v42 = vmul.f32 0.01, %v619_v28  ;;  %v414_v30 = vpop.permute.xlu1 %413 }
  0xfa   : > { %vm896_vm10 = vcmp.gt.f32.partialorder %v790_v31, 0.0  ;;  %v968_v38 = vmul.f32 0.01, %v790_v31  ;;  %v1495_v41 = vpack.c.bf16 %v1038_v37, %v1906_v29  ;;  %v1911_v44 = vadd.f32 %v624_v40, %v399_v25 }
  0xfb   : > { %v795_v43 = vpop.f32.mrb[4].mxu1  ;;  %vm898_vm12 = vcmp.gt.f32.partialorder %v623_v39, 0.0  ;;  %v970_v46 = vmul.f32 0.01, %v623_v39  ;;  %vm897_vm13 = vcmp.gt.f32.partialorder %v792_v35, 0.0  ;;  %v1037_v53 = vsel %vm893_vm9, %v786_v20, %v965_v34 }
  0xfc   : > { %v1040_v45 = vsel %vm896_vm10, %v790_v31, %v968_v38  ;;  %v796_v47 = vadd.f32 %v795_v43, %v399_v25  ;;  %v797_v48 = vpop.f32.mrb[5].mxu1  ;;  %v628_v51 = vpop.f32.mrb[6].mxu0  ;;  %v969_v54 = vmul.f32 0.01, %v792_v35  ;;  %vm899_vm14 = vcmp.gt.f32.partialorder %v1911_v44, 0.0 }
  0xfd   : > { %v1531_v50 = vpack.c.bf16 %v1040_v45, %v1908_v33  ;;  %v798_v55 = vadd.f32 %v797_v48, %v399_v25  ;;  %v629_v56 = vadd.f32 %v628_v51, %v404_v49  ;;  %v630_v57 = vpop.f32.mrb[7].mxu0  ;;  %v1917_v58 = vsel %vm898_vm12, %v623_v39, %v970_v46  ;;  %v419_v48 = vpop.permute.xlu0 %418 }
  0xfe   : > { %v972_v59 = vmul.f32 0.01, %v796_v47  ;;  %v631_v61 = vadd.f32 %v630_v57, %v404_v49  ;;  %v1039_v62 = vsel %vm895_vm11, %v619_v28, %v967_v42  ;;  %vm900_vm15 = vcmp.gt.f32.partialorder %v796_v47, 0.0 }
  0xff   : > { %v801_v60 = vpop.f32.mrb[6].mxu1  ;;  %vm902_vm0 = vcmp.gt.f32.partialorder %v629_v56, 0.0  ;;  %v974_v63 = vmul.f32 0.01, %v629_v56  ;;  %v1493_v7 = vpack.c.bf16 %v1039_v62, %v1035_v52  ;;  %v1041_v11 = vsel %vm897_vm13, %v792_v35, %v969_v54 }
 0x100   : > { %v802_v1 = vadd.f32 %v801_v60, %v404_v49  ;;  %v803_v2 = vpop.f32.mrb[7].mxu1  ;;  %vm903_vm1 = vcmp.gt.f32.partialorder %v631_v61, 0.0  ;;  %v975_v3 = vmul.f32 0.01, %v631_v61  ;;  %v634_v8 = vpop.f32.mrb[8].mxu0  ;;  %v1044_v14 = vsel %vm900_vm15, %v796_v47, %v972_v59 }
 0x101   : > { %v804_v6 = vadd.f32 %v803_v2, %v404_v49  ;;  %v1046_v0 = vsel %vm902_vm0, %v629_v56, %v974_v63  ;;  %v636_v12 = vpop.f32.mrb[9].mxu0  ;;  %v971_v15 = vmul.f32 0.01, %v1911_v44  ;;  %1494 = vmatprep.subr.bf16.mxu0 %v1493_v7  ;;  %v1529_v17 = vpack.c.bf16 %v1041_v11, %v1037_v53 }
 0x102   : > { %vm904_vm2 = vcmp.gt.f32.partialorder %v802_v1, 0.0  ;;  %v976_v10 = vmul.f32 0.01, %v802_v1  ;;  %v1499_v16 = vpack.c.bf16 %v1046_v0, %v1917_v58  ;;  %1496 = vmatpush1.bf16.msra.mxu0 %v1495_v41  ;;  %v635_v20 = vadd.f32 %v634_v8, %v409_v13 }
 0x103   : > { %v807_v18 = vpop.f32.mrb[8].mxu1  ;;  %v1924_v22 = vadd.f32 %v636_v12, %v409_v13  ;;  %v973_v24 = vmul.f32 0.01, %v798_v55  ;;  %v977_v26 = vmul.f32 0.01, %v804_v6  ;;  %1530 = vmatprep.subr.bf16.mxu1 %v1529_v17  ;;  %v1047_v28 = vsel %vm903_vm1, %v631_v61, %v975_v3 }
 0x104   : > { %v1048_v19 = vsel %vm904_vm2, %v802_v1, %v976_v10  ;;  %v808_v21 = vadd.f32 %v807_v18, %v409_v13  ;;  %v809_v23 = vpop.f32.mrb[9].mxu1  ;;  %v640_v27 = vpop.f32.mrb[10].mxu0  ;;  %vm901_vm3 = vcmp.gt.f32.partialorder %v798_v55, 0.0  ;;  %vm905_vm4 = vcmp.gt.f32.partialorder %v804_v6, 0.0  ;;  %1532 = vmatpush1.bf16.msra.mxu1 %v1531_v50 }
 0x105   : > { %v1535_v25 = vpack.c.bf16 %v1048_v19, %v1044_v14  ;;  %v1927_v29 = vadd.f32 %v809_v23, %v409_v13  ;;  %vm906_vm5 = vcmp.gt.f32.partialorder %v635_v20, 0.0  ;;  %v978_v31 = vmul.f32 0.01, %v635_v20  ;;  %v642_v36 = vpop.f32.mrb[11].mxu0 }
 0x106   : > { %v980_v32 = vmul.f32 0.01, %v808_v21  ;;  %v1043_v33 = vsel %vm899_vm14, %v1911_v44, %v971_v15  ;;  %vm908_vm6 = vcmp.gt.f32.partialorder %v808_v21, 0.0  ;;  %vm907_vm7 = vcmp.gt.f32.partialorder %v1924_v22, 0.0 }
 0x107   : > { %v641_v34 = vadd.f32 %v640_v27, %v414_v30  ;;  %v813_v35 = vpop.f32.mrb[10].mxu1  ;;  %v1497_v37 = vpack.c.bf16 %v1047_v28, %v1043_v33  ;;  %v643_v39 = vadd.f32 %v642_v36, %v414_v30  ;;  %v1045_v41 = vsel %vm901_vm3, %v798_v55, %v973_v24 }
 0x108   : > { %v814_v38 = vadd.f32 %v813_v35, %v414_v30  ;;  %v815_v40 = vpop.f32.mrb[11].mxu1  ;;  %v1049_v42 = vsel %vm905_vm4, %v804_v6, %v977_v26  ;;  %v646_v43 = vpop.f32.mrb[12].mxu0  ;;  %v979_v45 = vmul.f32 0.01, %v1924_v22  ;;  %v1937_v49 = vsel %vm906_vm5, %v635_v20, %v978_v31 }
 0x109   : > { %vm910_vm8 = vcmp.gt.f32.partialorder %v641_v34, 0.0  ;;  %v982_v46 = vmul.f32 0.01, %v641_v34  ;;  %1498 = vmatprep.subr.bf16.mxu0 %v1497_v37  ;;  %v1533_v44 = vpack.c.bf16 %v1049_v42, %v1045_v41  ;;  %v648_v47 = vpop.f32.mrb[13].mxu0  ;;  %v1940_v50 = vsel %vm908_vm6, %v808_v21, %v980_v32  ;;  %v424_v6 = vpop.permute.xlu1 %423 }
 0x10a   : > { %vm912_vm9 = vcmp.gt.f32.partialorder %v814_v38, 0.0  ;;  %v984_v51 = vmul.f32 0.01, %v814_v38  ;;  %1500 = vmatpush1.bf16.msra.mxu0 %v1499_v16  ;;  %v983_v53 = vmul.f32 0.01, %v643_v39  ;;  %v816_v54 = vadd.f32 %v815_v40, %v414_v30  ;;  %v429_v26 = vpop.permute.xlu0 %428 }
 0x10b   : > { %v1942_v52 = vsel %vm910_vm8, %v641_v34, %v982_v46  ;;  %1534 = vmatprep.subr.bf16.mxu1 %v1533_v44  ;;  %v647_v55 = vadd.f32 %v646_v43, %v419_v48  ;;  %v819_v56 = vpop.f32.mrb[12].mxu1  ;;  %v1948_v60 = vadd.f32 %v648_v47, %v419_v48  ;;  %vm909_vm11 = vcmp.gt.f32.partialorder %v1927_v29, 0.0 }
 0x10c   : > { %v1503_v57 = vpack.c.bf16 %v1942_v52, %v1937_v49  ;;  %v1946_v58 = vsel %vm912_vm9, %v814_v38, %v984_v51  ;;  %1536 = vmatpush1.bf16.msra.mxu1 %v1535_v25  ;;  %v820_v59 = vadd.f32 %v819_v56, %v419_v48  ;;  %v821_v61 = vpop.f32.mrb[13].mxu1  ;;  %v652_v62 = vpop.f32.mrb[14].mxu0  ;;  %v981_v7 = vmul.f32 0.01, %v1927_v29 }
 0x10d   : > { %v1539_v63 = vpack.c.bf16 %v1946_v58, %v1940_v50  ;;  %vm914_vm10 = vcmp.gt.f32.partialorder %v647_v55, 0.0  ;;  %v986_v1 = vmul.f32 0.01, %v647_v55  ;;  %v1952_v2 = vadd.f32 %v821_v61, %v419_v48  ;;  %v654_v3 = vpop.f32.mrb[15].mxu0  ;;  %v434_v38 = vpop.permute.xlu1 %433 }
 0x10e   : > { %vm911_vm12 = vcmp.gt.f32.partialorder %v643_v39, 0.0  ;;  %v988_v8 = vmul.f32 0.01, %v820_v59  ;;  %vm913_vm13 = vcmp.gt.f32.partialorder %v816_v54, 0.0  ;;  %v985_v0 = vmul.f32 0.01, %v816_v54 }
 0x10f   : > { %vm916_vm14 = vcmp.gt.f32.partialorder %v820_v59, 0.0  ;;  %v653_v10 = vadd.f32 %v652_v62, %v424_v6  ;;  %v825_v11 = vpop.f32.mrb[14].mxu1  ;;  %v1956_v12 = vsel %vm914_vm10, %v647_v55, %v986_v1  ;;  %v1959_v13 = vmul.f32 0.01, %v1948_v60 }
 0x110   : > { %v826_v14 = vadd.f32 %v825_v11, %v424_v6  ;;  %v1961_v15 = vadd.f32 %v654_v3, %v424_v6  ;;  %v827_v16 = vpop.f32.mrb[15].mxu1  ;;  %v658_v17 = vpop.f32.mrb[16].mxu0  ;;  %vm915_vm15 = vcmp.gt.f32.partialorder %v1948_v60, 0.0  ;;  %v1965_v18 = vmul.f32 0.01, %v1952_v2 }
 0x111   : > { %vm918_vm0 = vcmp.gt.f32.partialorder %v653_v10, 0.0  ;;  %v990_v19 = vmul.f32 0.01, %v653_v10  ;;  %v1055_v20 = vsel %vm911_vm12, %v643_v39, %v983_v53  ;;  %v660_v21 = vpop.f32.mrb[17].mxu0  ;;  %v1968_v23 = vsel %vm916_vm14, %v820_v59, %v988_v8 }
 0x112   : > { %vm917_vm1 = vcmp.gt.f32.partialorder %v1952_v2, 0.0  ;;  %vm920_vm2 = vcmp.gt.f32.partialorder %v826_v14, 0.0  ;;  %v992_v24 = vmul.f32 0.01, %v826_v14  ;;  %v1051_v25 = vsel %vm907_vm7, %v1924_v22, %v979_v45 }
 0x113   : > { %v1974_v27 = vsel %vm918_vm0, %v653_v10, %v990_v19  ;;  %v991_v28 = vmul.f32 0.01, %v1961_v15  ;;  %v828_v30 = vadd.f32 %v827_v16, %v424_v6  ;;  %v1501_v31 = vpack.c.bf16 %v1055_v20, %v1051_v25  ;;  %v831_v32 = vpop.f32.mrb[16].mxu1 }
 0x114   : > { %v1507_v33 = vpack.c.bf16 %v1974_v27, %v1956_v12  ;;  %v1979_v34 = vsel %vm920_vm2, %v826_v14, %v992_v24  ;;  %v1053_v35 = vsel %vm909_vm11, %v1927_v29, %v981_v7  ;;  %v1057_v36 = vsel %vm913_vm13, %v816_v54, %v985_v0  ;;  %v833_v22 = vpop.f32.mrb[17].mxu1  ;;  %v664_v37 = vpop.f32.mrb[18].mxu0 }
 0x115   : > { %v1543_v39 = vpack.c.bf16 %v1979_v34, %v1968_v23  ;;  %1502 = vmatprep.subr.bf16.mxu0 %v1501_v31  ;;  %v1537_v40 = vpack.c.bf16 %v1057_v36, %v1053_v35  ;;  %v659_v41 = vadd.f32 %v658_v17, %v429_v26  ;;  %v832_v42 = vadd.f32 %v831_v32, %v429_v26  ;;  %v666_v43 = vpop.f32.mrb[19].mxu0  ;;  %v439_v7 = vpop.permute.xlu0 %438 }
 0x116   : > { %1504 = vmatpush1.bf16.msra.mxu0 %v1503_v57  ;;  %v1987_v45 = vadd.f32 %v660_v21, %v429_v26  ;;  %v1989_v46 = vadd.f32 %v833_v22, %v429_v26  ;;  %v665_v44 = vadd.f32 %v664_v37, %v434_v38  ;;  %v1991_v47 = vadd.f32 %v666_v43, %v434_v38 }
 0x117   : > { %v837_v29 = vpop.f32.mrb[18].mxu1  ;;  %1538 = vmatprep.subr.bf16.mxu1 %v1537_v40  ;;  %vm922_vm3 = vcmp.gt.f32.partialorder %v659_v41, 0.0  ;;  %v994_v48 = vmul.f32 0.01, %v659_v41  ;;  %vm924_vm4 = vcmp.gt.f32.partialorder %v832_v42, 0.0  ;;  %vm919_vm5 = vcmp.gt.f32.partialorder %v1961_v15, 0.0 }
 0x118   : > { %v996_v49 = vmul.f32 0.01, %v832_v42  ;;  %vm921_vm6 = vcmp.gt.f32.partialorder %v828_v30, 0.0  ;;  %v993_v51 = vmul.f32 0.01, %v828_v30  ;;  %1540 = vmatpush1.bf16.msra.mxu1 %v1539_v63  ;;  %vm923_vm7 = vcmp.gt.f32.partialorder %v1987_v45, 0.0 }
 0x119   : > { %v1998_v52 = vmul.f32 0.01, %v1987_v45  ;;  %vm926_vm8 = vcmp.gt.f32.partialorder %v665_v44, 0.0  ;;  %v998_v53 = vmul.f32 0.01, %v665_v44  ;;  %v839_v54 = vpop.f32.mrb[19].mxu1  ;;  %v2001_v56 = vsel %vm922_vm3, %v659_v41, %v994_v48 }
 0x11a   : > { %v670_v55 = vpop.f32.mrb[20].mxu0  ;;  %v2003_v57 = vsel %vm924_vm4, %v832_v42, %v996_v49  ;;  %v2006_v59 = vmul.f32 0.01, %v1989_v46  ;;  %v838_v61 = vadd.f32 %v837_v29, %v434_v38  ;;  %vm925_vm9 = vcmp.gt.f32.partialorder %v1989_v46, 0.0 }
 0x11b   : > { %v843_v62 = vpop.f32.mrb[20].mxu1  ;;  %v672_v50 = vpop.f32.mrb[21].mxu0  ;;  %v2009_v58 = vsel %vm926_vm8, %v665_v44, %v998_v53  ;;  %v999_v63 = vmul.f32 0.01, %v1991_v47  ;;  %v2012_v1 = vadd.f32 %v839_v54, %v434_v38  ;;  %v1063_v3 = vsel %vm919_vm5, %v1961_v15, %v991_v28 }
 0x11c   : > { %v845_v6 = vpop.f32.mrb[21].mxu1  ;;  %v1511_v8 = vpack.c.bf16 %v2009_v58, %v2001_v56  ;;  %vm928_vm10 = vcmp.gt.f32.partialorder %v838_v61, 0.0  ;;  %v1000_v0 = vmul.f32 0.01, %v838_v61  ;;  %v1059_v10 = vsel %vm915_vm15, %v1948_v60, %v1959_v13  ;;  %v676_v11 = vpop.f32.mrb[22].mxu0 }
 0x11d   : > { %v1505_v14 = vpack.c.bf16 %v1063_v3, %v1059_v10  ;;  %v1061_v16 = vsel %vm917_vm1, %v1952_v2, %v1965_v18  ;;  %v1065_v15 = vsel %vm921_vm6, %v828_v30, %v993_v51  ;;  %v671_v17 = vadd.f32 %v670_v55, %v439_v7  ;;  %v678_v19 = vpop.f32.mrb[23].mxu0  ;;  %v444_v18 = vpop.permute.xlu1 %443 }
 0x11e   : > { %v2028_v20 = vsel %vm928_vm10, %v838_v61, %v1000_v0  ;;  %v1541_v21 = vpack.c.bf16 %v1065_v15, %v1061_v16  ;;  %v844_v24 = vadd.f32 %v843_v62, %v439_v7  ;;  %v2030_v25 = vadd.f32 %v672_v50, %v439_v7  ;;  %v449_v44 = vpop.permute.xlu0 %448 }
 0x11f   : > { %v849_v26 = vpop.f32.mrb[22].mxu1  ;;  %v1547_v60 = vpack.c.bf16 %v2028_v20, %v2003_v57  ;;  %1506 = vmatprep.subr.bf16.mxu0 %v1505_v14  ;;  %vm930_vm11 = vcmp.gt.f32.partialorder %v671_v17, 0.0  ;;  %v1002_v13 = vmul.f32 0.01, %v671_v17  ;;  %v2034_v28 = vadd.f32 %v845_v6, %v439_v7 }
 0x120   : > { %v851_v2 = vpop.f32.mrb[23].mxu1  ;;  %vm927_vm12 = vcmp.gt.f32.partialorder %v1991_v47, 0.0  ;;  %vm929_vm13 = vcmp.gt.f32.partialorder %v2012_v1, 0.0  ;;  %1542 = vmatprep.subr.bf16.mxu1 %v1541_v21  ;;  %1508 = vmatpush1.bf16.msra.mxu0 %v1507_v33  ;;  %vm932_vm14 = vcmp.gt.f32.partialorder %v844_v24, 0.0  ;;  %v1004_v30 = vmul.f32 0.01, %v844_v24 }
 0x121   : > { %v1001_v31 = vmul.f32 0.01, %v2012_v1  ;;  %1544 = vmatpush1.bf16.msra.mxu1 %v1543_v39  ;;  %v2045_v32 = vsel %vm930_vm11, %v671_v17, %v1002_v13  ;;  %v2048_v35 = vmul.f32 0.01, %v2030_v25  ;;  %v677_v36 = vadd.f32 %v676_v11, %v444_v18  ;;  %v682_v22 = vpop.f32.mrb[24].mxu0  ;;  %v454_v61 = vpop.permute.xlu1 %453 }
 0x122   : > { %v2051_v37 = vmul.f32 0.01, %v2034_v28  ;;  %v850_v12 = vadd.f32 %v849_v26, %v444_v18  ;;  %v2053_v27 = vadd.f32 %v678_v19, %v444_v18  ;;  %v2055_v33 = vadd.f32 %v851_v2, %v444_v18  ;;  %v684_v40 = vpop.f32.mrb[25].mxu0 }
 0x123   : > { %v855_v38 = vpop.f32.mrb[24].mxu1  ;;  %v2057_v41 = vsel %vm932_vm14, %v844_v24, %v1004_v30  ;;  %vm931_vm15 = vcmp.gt.f32.partialorder %v2030_v25, 0.0  ;;  %vm933_vm0 = vcmp.gt.f32.partialorder %v2034_v28, 0.0  ;;  %vm934_vm1 = vcmp.gt.f32.partialorder %v677_v36, 0.0 }
 0x124   : > { %v1006_v23 = vmul.f32 0.01, %v677_v36  ;;  %v1071_v34 = vsel %vm927_vm12, %v1991_v47, %v999_v63  ;;  %v857_v39 = vpop.f32.mrb[25].mxu1  ;;  %vm936_vm2 = vcmp.gt.f32.partialorder %v850_v12, 0.0  ;;  %v1008_v42 = vmul.f32 0.01, %v850_v12 }
 0x125   : > { %vm935_vm3 = vcmp.gt.f32.partialorder %v2053_v27, 0.0  ;;  %v1067_v43 = vsel %vm923_vm7, %v1987_v45, %v1998_v52  ;;  %v1007_v48 = vmul.f32 0.01, %v2053_v27  ;;  %vm937_vm4 = vcmp.gt.f32.partialorder %v2055_v33, 0.0  ;;  %v688_v51 = vpop.f32.mrb[26].mxu0 }
 0x126   : > { %v2069_v29 = vsel %vm934_vm1, %v677_v36, %v1006_v23  ;;  %v1509_v49 = vpack.c.bf16 %v1071_v34, %v1067_v43  ;;  %v2075_v53 = vsel %vm936_vm2, %v850_v12, %v1008_v42  ;;  %v1069_v54 = vsel %vm925_vm9, %v1989_v46, %v2006_v59  ;;  %v690_v55 = vpop.f32.mrb[27].mxu0  ;;  %v459_v12 = vpop.permute.xlu0 %458 }
 0x127   : > { %v1515_v47 = vpack.c.bf16 %v2069_v29, %v2045_v32  ;;  %v1073_v45 = vsel %vm929_vm13, %v2012_v1, %v1001_v31  ;;  %v861_v52 = vpop.f32.mrb[26].mxu1  ;;  %v1551_v62 = vpack.c.bf16 %v2075_v53, %v2057_v41  ;;  %v683_v63 = vadd.f32 %v682_v22, %v449_v44 }
 0x128   : > { %1510 = vmatprep.subr.bf16.mxu0 %v1509_v49  ;;  %v1545_v50 = vpack.c.bf16 %v1073_v45, %v1069_v54  ;;  %v856_v3 = vadd.f32 %v855_v38, %v449_v44  ;;  %v863_v6 = vpop.f32.mrb[27].mxu1  ;;  %v2089_v46 = vadd.f32 %v684_v40, %v449_v44  ;;  %v2091_v59 = vadd.f32 %v857_v39, %v449_v44  ;;  %v694_v0 = vpop.f32.mrb[28].mxu0 }
 0x129   : > { %1512 = vmatpush1.bf16.msra.mxu0 %v1511_v8  ;;  %v689_v1 = vadd.f32 %v688_v51, %v454_v61  ;;  %v862_v7 = vadd.f32 %v861_v52, %v454_v61  ;;  %v1009_v10 = vmul.f32 0.01, %v2055_v33  ;;  %v1010_v11 = vmul.f32 0.01, %v683_v63  ;;  %v696_v15 = vpop.f32.mrb[29].mxu0  ;;  %v464_v39 = vpop.permute.xlu1 %463 }
 0x12a   : > { %1546 = vmatprep.subr.bf16.mxu1 %v1545_v50  ;;  %v1012_v14 = vmul.f32 0.01, %v856_v3  ;;  %vm938_vm5 = vcmp.gt.f32.partialorder %v683_v63, 0.0  ;;  %vm940_vm6 = vcmp.gt.f32.partialorder %v856_v3, 0.0  ;;  %v2098_v56 = vmul.f32 0.01, %v2089_v46 }
 0x12b   : > { %1548 = vmatpush1.bf16.msra.mxu1 %v1547_v60  ;;  %v2101_v58 = vmul.f32 0.01, %v2091_v59  ;;  %vm939_vm7 = vcmp.gt.f32.partialorder %v2089_v46, 0.0  ;;  %vm942_vm8 = vcmp.gt.f32.partialorder %v689_v1, 0.0  ;;  %v1014_v8 = vmul.f32 0.01, %v689_v1 }
 0x12c   : > { %v867_v16 = vpop.f32.mrb[28].mxu1  ;;  %vm941_vm9 = vcmp.gt.f32.partialorder %v2091_v59, 0.0  ;;  %vm944_vm10 = vcmp.gt.f32.partialorder %v862_v7, 0.0  ;;  %v1016_v17 = vmul.f32 0.01, %v862_v7  ;;  %v691_v57 = vadd.f32 %v690_v55, %v454_v61  ;;  %v700_v21 = vpop.f32.mrb[30].mxu0 }
 0x12d   : > { %v2105_v19 = vadd.f32 %v863_v6, %v454_v61  ;;  %v869_v20 = vpop.f32.mrb[29].mxu1  ;;  %v2108_v24 = vsel %vm938_vm5, %v683_v63, %v1010_v11  ;;  %v2111_v26 = vsel %vm940_vm6, %v856_v3, %v1012_v14  ;;  %v2113_v60 = vsel %vm942_vm8, %v689_v1, %v1014_v8  ;;  %v702_v2 = vpop.f32.mrb[31].mxu0 }
 0x12e   : > { %v1079_v13 = vsel %vm935_vm3, %v2053_v27, %v1007_v48  ;;  %v1519_v18 = vpack.c.bf16 %v2113_v60, %v2108_v24  ;;  %v2120_v30 = vsel %vm944_vm10, %v862_v7, %v1016_v17  ;;  %v1075_v31 = vsel %vm931_vm15, %v2030_v25, %v2048_v35  ;;  %v469_v8 = vpop.permute.xlu0 %468  ;;  %v474_v17 = vpop.permute.xlu1 %473 }
 0x12f   : > { %v1077_v36 = vsel %vm933_vm0, %v2034_v28, %v2051_v37  ;;  %v873_v22 = vpop.f32.mrb[30].mxu1  ;;  %v1555_v27 = vpack.c.bf16 %v2120_v30, %v2111_v26  ;;  %v1015_v38 = vmul.f32 0.01, %v691_v57  ;;  %v1017_v40 = vmul.f32 0.01, %v2105_v19 }
 0x130   : > { %v1513_v23 = vpack.c.bf16 %v1079_v13, %v1075_v31  ;;  %v875_v34 = vpop.f32.mrb[31].mxu1  ;;  %v1081_v25 = vsel %vm937_vm4, %v2055_v33, %v1009_v10  ;;  %v695_v35 = vadd.f32 %v694_v0, %v459_v12  ;;  %v868_v42 = vadd.f32 %v867_v16, %v459_v12  ;;  %v706_v28 = vpop.f32.mrb[32].mxu0 }
 0x131   : > { %v2136_v43 = vadd.f32 %v696_v15, %v459_v12  ;;  %v1549_v37 = vpack.c.bf16 %v1081_v25, %v1077_v36  ;;  %v2138_v44 = vadd.f32 %v869_v20, %v459_v12  ;;  %v701_v48 = vadd.f32 %v700_v21, %v464_v39  ;;  %v708_v51 = vpop.f32.mrb[33].mxu0 }
 0x132   : > { %1514 = vmatprep.subr.bf16.mxu0 %v1513_v23  ;;  %v874_v49 = vadd.f32 %v873_v22, %v464_v39  ;;  %vm943_vm11 = vcmp.gt.f32.partialorder %v691_v57, 0.0  ;;  %vm946_vm12 = vcmp.gt.f32.partialorder %v695_v35, 0.0  ;;  %v1018_v54 = vmul.f32 0.01, %v695_v35 }
 0x133   : > { %1516 = vmatpush1.bf16.msra.mxu0 %v1515_v47  ;;  %v1020_v33 = vmul.f32 0.01, %v868_v42  ;;  %vm945_vm13 = vcmp.gt.f32.partialorder %v2105_v19, 0.0  ;;  %1550 = vmatprep.subr.bf16.mxu1 %v1549_v37  ;;  %vm948_vm14 = vcmp.gt.f32.partialorder %v868_v42, 0.0  ;;  %v2145_v45 = vmul.f32 0.01, %v2136_v43 }
 0x134   : > { %v2148_v52 = vmul.f32 0.01, %v2138_v44  ;;  %1552 = vmatpush1.bf16.msra.mxu1 %v1551_v62  ;;  %v2153_v55 = vsel %vm946_vm12, %v695_v35, %v1018_v54  ;;  %vm947_vm15 = vcmp.gt.f32.partialorder %v2136_v43, 0.0  ;;  %vm950_vm0 = vcmp.gt.f32.partialorder %v701_v48, 0.0  ;;  %v879_v29 = vpop.f32.mrb[32].mxu1  ;;  %v712_v47 = vpop.f32.mrb[34].mxu0 }
 0x135   : > { %v1022_v32 = vmul.f32 0.01, %v701_v48  ;;  %vm952_vm1 = vcmp.gt.f32.partialorder %v874_v49, 0.0  ;;  %v1024_v61 = vmul.f32 0.01, %v874_v49  ;;  %v703_v50 = vadd.f32 %v702_v2, %v464_v39  ;;  %v881_v3 = vpop.f32.mrb[33].mxu1 }
 0x136   : > { %v876_v63 = vadd.f32 %v875_v34, %v464_v39  ;;  %v714_v6 = vpop.f32.mrb[35].mxu0  ;;  %v2157_v1 = vsel %vm948_vm14, %v868_v42, %v1020_v33  ;;  %v1083_v41 = vsel %vm939_vm7, %v2089_v46, %v2098_v56  ;;  %v1087_v53 = vsel %vm943_vm11, %v691_v57, %v1015_v38 }
 0x137   : > { %v2159_v7 = vsel %vm950_vm0, %v701_v48, %v1022_v32  ;;  %v885_v62 = vpop.f32.mrb[34].mxu1  ;;  %vm949_vm2 = vcmp.gt.f32.partialorder %v2138_v44, 0.0  ;;  %v2169_v10 = vsel %vm952_vm1, %v874_v49, %v1024_v61  ;;  %vm951_vm3 = vcmp.gt.f32.partialorder %v703_v50, 0.0 }
 0x138   : > { %v1523_v0 = vpack.c.bf16 %v2159_v7, %v2153_v55  ;;  %v1085_v11 = vsel %vm941_vm9, %v2091_v59, %v2101_v58  ;;  %v887_v14 = vpop.f32.mrb[35].mxu1  ;;  %v1559_v46 = vpack.c.bf16 %v2169_v10, %v2157_v1  ;;  %v1023_v56 = vmul.f32 0.01, %v703_v50 }
 0x139   : > { %v1025_v16 = vmul.f32 0.01, %v876_v63  ;;  %v1517_v15 = vpack.c.bf16 %v1087_v53, %v1083_v41  ;;  %v1089_v57 = vsel %vm945_vm13, %v2105_v19, %v1017_v40  ;;  %v707_v20 = vadd.f32 %v706_v28, %v469_v8 }
 0x13a   : > { %v880_v21 = vadd.f32 %v879_v29, %v469_v8  ;;  %v709_v13 = vadd.f32 %v708_v51, %v469_v8  ;;  %v1553_v2 = vpack.c.bf16 %v1089_v57, %v1085_v11  ;;  %v882_v31 = vadd.f32 %v881_v3, %v469_v8 }
 0x13b   : > { %1518 = vmatprep.subr.bf16.mxu0 %v1517_v15  ;;  %v713_v59 = vadd.f32 %v712_v47, %v474_v17  ;;  %v886_v58 = vadd.f32 %v885_v62, %v474_v17  ;;  %vm953_vm4 = vcmp.gt.f32.partialorder %v876_v63, 0.0  ;;  %vm954_vm5 = vcmp.gt.f32.partialorder %v707_v20, 0.0 }
 0x13c   : > { %1520 = vmatpush1.bf16.msra.mxu0 %v1519_v18  ;;  %v1026_v36 = vmul.f32 0.01, %v707_v20  ;;  %v1028_v22 = vmul.f32 0.01, %v880_v21  ;;  %1554 = vmatprep.subr.bf16.mxu1 %v1553_v2  ;;  %vm956_vm6 = vcmp.gt.f32.partialorder %v880_v21, 0.0  ;;  %vm955_vm7 = vcmp.gt.f32.partialorder %v709_v13, 0.0 }
 0x13d   : > { %v1027_v19 = vmul.f32 0.01, %v709_v13  ;;  %vm957_vm8 = vcmp.gt.f32.partialorder %v882_v31, 0.0  ;;  %1556 = vmatpush1.bf16.msra.mxu1 %v1555_v27  ;;  %v1029_v38 = vmul.f32 0.01, %v882_v31  ;;  %vm958_vm9 = vcmp.gt.f32.partialorder %v713_v59, 0.0 }
 0x13e   : > { %v1098_v12 = vsel %vm954_vm5, %v707_v20, %v1026_v36  ;;  %v1030_v40 = vmul.f32 0.01, %v713_v59  ;;  %vm960_vm10 = vcmp.gt.f32.partialorder %v886_v58, 0.0  ;;  %v1032_v23 = vmul.f32 0.01, %v886_v58 }
 0x13f   : > { %v715_v24 = vadd.f32 %v714_v6, %v474_v17  ;;  %v888_v60 = vadd.f32 %v887_v14, %v474_v17  ;;  %v1100_v18 = vsel %vm956_vm6, %v880_v21, %v1028_v22  ;;  %v1091_v39 = vsel %vm947_vm15, %v2136_v43, %v2145_v45 }
 0x140   : > { %v1102_v34 = vsel %vm958_vm9, %v713_v59, %v1030_v40  ;;  %v1095_v25 = vsel %vm951_vm3, %v703_v50, %v1023_v56  ;;  %v1104_v26 = vsel %vm960_vm10, %v886_v58, %v1032_v23  ;;  %v1093_v37 = vsel %vm949_vm2, %v2138_v44, %v2148_v52 }
 0x141   : > { %v1527_v35 = vpack.c.bf16 %v1102_v34, %v1098_v12  ;;  %vm959_vm11 = vcmp.gt.f32.partialorder %v715_v24, 0.0  ;;  %v1031_v30 = vmul.f32 0.01, %v715_v24  ;;  %v1563_v27 = vpack.c.bf16 %v1104_v26, %v1100_v18 }
 0x142   : > { %vm961_vm12 = vcmp.gt.f32.partialorder %v888_v60, 0.0  ;;  %v1033_v42 = vmul.f32 0.01, %v888_v60  ;;  %v1521_v28 = vpack.c.bf16 %v1095_v25, %v1091_v39  ;;  %v1097_v48 = vsel %vm953_vm4, %v876_v63, %v1025_v16 }
 0x143   : > { %v1099_v49 = vsel %vm955_vm7, %v709_v13, %v1027_v19  ;;  %v1103_v43 = vsel %vm959_vm11, %v715_v24, %v1031_v30  ;;  %v1557_v51 = vpack.c.bf16 %v1097_v48, %v1093_v37  ;;  %v1101_v33 = vsel %vm957_vm8, %v882_v31, %v1029_v38 }
 0x144   : > { %1522 = vmatprep.subr.bf16.mxu0 %v1521_v28  ;;  %v1525_v54 = vpack.c.bf16 %v1103_v43, %v1099_v49  ;;  %v1105_v45 = vsel %vm961_vm12, %v888_v60, %v1033_v42  ;;  %v1108_v44 = vstv %s1107_s20  ;;  %vm1319_vm13 = vcmp.lt.s32.totalorder %v1110_v4, 512 }
 0x145   : > { %1524 = vmatpush1.bf16.msra.mxu0 %v1523_v0  ;;  %v1561_v55 = vpack.c.bf16 %v1105_v45, %v1101_v33  ;;  %1558 = vmatprep.subr.bf16.mxu1 %v1557_v51 }
 0x146   : > { %1526 = vmatprep.subr.bf16.mxu0 %v1525_v54  ;;  %1560 = vmatpush1.bf16.msra.mxu1 %v1559_v46  ;;  %v1638_v46 = vmov 1966171168  }
 0x147   : > { %1562 = vmatprep.subr.bf16.mxu1 %v1561_v55  ;;  %v1295_v56 = vunpack.c.l.s4 %v1638_v46 }
 0x149   : > { %1528 = vmatpush1.bf16.msra.mxu0 %v1527_v35  ;;  %v1296_v16 = vunpack.c.0.s8 %v1295_v56 }
 0x14a   : > { %1564 = vmatpush1.bf16.msra.mxu1 %v1563_v27 }
 0x14b   : > { %v1299_v17 = vsub.s32 %v1296_v16, %v1897_v5 }
 0x14c   : > { %1187 = vmatmul.mubr.f32.vlgmr.msra.gmra.mrb[36].mxu0 %v1904_v9 }
 0x14d   : > { %1258 = vmatmul.mubr.f32.vlgmr.msra.gmra.mrb[36].mxu1 %v1904_v9 }
 0x21f   : > { %v1188_v52 = vpop.f32.mrb[36].mxu0 }
 0x220   : > { %v1189_v32 = vadd.f32 %v1188_v52, %v1108_v44  ;;  %v1190_v29 = vpop.f32.mrb[37].mxu0  ;;  %v1259_v47 = vpop.f32.mrb[36].mxu1 }
 0x221   : > { %v1191_v61 = vadd.f32 %v1190_v29, %v1108_v44  ;;  %v1260_v63 = vadd.f32 %v1259_v47, %v1108_v44  ;;  %v1261_v3 = vpop.f32.mrb[37].mxu1 }
 0x222   : > { %v1473_v50 = vmul.f32 -1.442695, %v1189_v32  ;;  %v1262_v1 = vadd.f32 %v1261_v3, %v1108_v44 }
 0x223   : > { %v1474_v6 = vmul.f32 -1.442695, %v1191_v61  ;;  %v1475_v7 = vmul.f32 -1.442695, %v1260_v63 }
 0x224   : > { %1595 = vpow2.f32 %v1473_v50  ;;  %v1476_v41 = vmul.f32 -1.442695, %v1262_v1 }
 0x225   : > { %1597 = vpow2.f32 %v1474_v6 }
 0x226   : > { %1599 = vpow2.f32 %v1475_v7 }
 0x227   : > { %1601 = vpow2.f32 %v1476_v41 }
 0x22e   : > { %v1596_v53 = vpop.eup %1595 }
 0x22f   : > { %v1598_v9 = vpop.eup %1597  ;;  %v1276_v62 = vadd.f32 1.0, %v1596_v53 }
 0x230   : > { %v1600_v0 = vpop.eup %1599  ;;  %v1277_v10 = vadd.f32 1.0, %v1598_v9 }
 0x231   : > { %v1602_v11 = vpop.eup %1601  ;;  %1603 = vrcp.f32 %v1276_v62  ;;  %v1278_v14 = vadd.f32 1.0, %v1600_v0 }
 0x232   : > { %1605 = vrcp.f32 %v1277_v10  ;;  %v1279_v8 = vadd.f32 1.0, %v1602_v11 }
 0x233   : > { %1607 = vrcp.f32 %v1278_v14 }
 0x234   : > { %1609 = vrcp.f32 %v1279_v8 }
 0x23b   : > { %v1604_v15 = vpop.eup %1603 }
 0x23c   : > { %v1606_v57 = vpop.eup %1605 }
 0x23d   : > { %v1608_v20 = vpop.eup %1607  ;;  %v1292_v21 = vcombine.low %v1604_v15, %v1606_v57 }
 0x23e   : > { %v1610_v13 = vpop.eup %1609 }
 0x23f   : > { %v1300_v2 = vrot.slane %v1292_v21, %v1299_v17  ;;  %v1293_v31 = vcombine.low %v1608_v20, %v1610_v13 }
 0x241   : > { %v1307_v59 = vrot.slane %v1293_v31, %v1299_v17 }
 0x243   : > { %v1308_v58 = vcombine.low %v1300_v2, %v1307_v59 }
 0x245   : > { %v1315_v36 = vrot.slane %v1308_v58, %v1299_v17 }
 0x247   : > { %1321 = vst.msk [vmem:[%s324_s27] sm:$0xf] %vm1319_vm13, %v1315_v36 }
 0x248 PF: > { %s17_s25 = sadd.s32 1, %s1633_s25   ;;  %s2224_s23 = smov %s1629_s24 }
 0x249   : > { %p14_p5 = scmp.ge.s32.totalorder %s17_s25, 4   ;;  %s2225_s24 = smov %s2227_s5 }
 0x24b   :  { %16 = sbr.rel (!%p14_p5) target bundleno = 2 (0x2), region = 77 }

</bundles_post_ra>
